<compile_context>
chip_gen: v7x
topology: tpu7x:2x2x1
jax: 0.10.0
libtpu: 0.0.40
codegen_flags: <defaults>
</compile_context>

<pallas_src>
from functools import partial

import jax
import jax.numpy as jnp
from jax import lax
from jax.experimental import pallas as pl
from jax.experimental.pallas import tpu as pltpu


def _round_up(a, m):
    return ((a + m - 1) // m) * m


def categorizer_kernel(x_ref, p_ref, o_ref, *, in_dim, latent, strip):
    # x_ref: [in_dim, tile_rows, 128] VMEM  (batch packed over sublanes x lanes)
    # p_ref: [in_dim*latent + latent + latent + 1] f32 SMEM, packed as
    #        [ W1 row-major | b1 | W2 | b2 ]   (W1: [in_dim, latent], W2: [latent])
    # o_ref: [tile_rows, 128] VMEM (fully packed output slab)
    b1_off = in_dim * latent
    w2_off = b1_off + latent
    b2_off = w2_off + latent

    # Hoist every scalar weight read out of the strip loop (they live in sregs).
    w1 = [[p_ref[k * latent + j] for j in range(latent)] for k in range(in_dim)]
    b1 = [p_ref[b1_off + j] for j in range(latent)]
    w2 = [p_ref[w2_off + j] for j in range(latent)]
    b2 = p_ref[b2_off]

    tile_rows, lanes = o_ref.shape
    n_strips = tile_rows // strip

    # Strip-mine the tile: per strip only feats(2) + h + acc slabs are live,
    # so vreg pressure stays ~4 vregs per sublane-group regardless of tile size.
    def strip_body(s, carry):
        r0 = pl.multiple_of(s * strip, strip)
        feats = [x_ref[k, pl.ds(r0, strip), :].astype(jnp.float32)
                 for k in range(in_dim)]
        # TODO(synk): on v6e/v7x (bf16 VALU) keep feats/h in bf16 (gate with
        # pltpu.get_tpu_info()) to halve VALU work; v5e must stay f32.
        acc = jnp.full((strip, lanes), b2, jnp.float32)
        for j in range(latent):                     # static unroll: 10 hidden units
            h = feats[0] * w1[0][j]
            for k in range(1, in_dim):
                h = h + feats[k] * w1[k][j]
            h = jnp.maximum(h + b1[j], 0.0)         # + b1[j], ReLU
            acc = acc + h * w2[j]                   # * W2[j]
        o_ref[pl.ds(r0, strip), :] = acc.astype(o_ref.dtype)
        return carry

    lax.fori_loop(0, n_strips, strip_body, 0)


def categorizer_forward(x, w1, b1, w2, b2, *, tile_rows=4096, io_dtype=None):
    """out = relu(x @ W1 + b1) @ W2 + b2, with x: [N, in_dim] -> out: [N, 1]."""
    N, in_dim = x.shape
    latent = w1.shape[1]
    lanes, sub = 128, 8

    io_dtype = x.dtype if io_dtype is None else io_dtype

    # Pack the batch over (sublane, lane): pad only to an (8*128)-point boundary
    # so the reshape below is a free view.  Ragged tails past the tile boundary
    # are handled by the cdiv grid (masked writeback on the partial last block).
    n_pad = _round_up(max(N, 1), sub * lanes)
    n_rows = n_pad // lanes

    # Big tile to amortize per-step overhead, but (a) split into >=2 tiles when
    # there is enough work (both v7x TCs) and (b) keep double-buffered VMEM small.
    tile_rows = max(sub, min(int(tile_rows), _round_up((n_rows + 1) // 2, sub)))
    grid = (pl.cdiv(n_rows, tile_rows),)

    # Feature-major, (rows, lane)-packed view of the batch.  The transpose (and
    # the <1024-row pad, when N is ragged) is one wrapper-side HBM pass.
    # TODO(synk): remove this pass entirely via CompilerParams(allow_input_fusion)
    # or by consuming the natural interleaved [N,2] layout with an in-kernel
    # pltpu.roll + lane-parity select de-interleave.
    xt = jnp.swapaxes(x, 0, 1).astype(io_dtype)           # [in_dim, N]
    if n_pad != N:
        xt = jnp.pad(xt, ((0, 0), (0, n_pad - N)))        # [in_dim, n_pad]
    xt = xt.reshape(in_dim, n_rows, lanes)                 # free view

    # All the tiny constants packed into one SMEM-resident f32 array.
    params = jnp.concatenate(
        [w1.reshape(-1), b1.reshape(-1), w2.reshape(-1), b2.reshape(-1)]
    ).astype(jnp.float32)

    # In-kernel strip size (must divide tile_rows; both are multiples of 8).
    strip = 64
    while tile_rows % strip:
        strip //= 2

    x_block_bytes = in_dim * tile_rows * lanes * jnp.dtype(io_dtype).itemsize
    o_block_bytes = tile_rows * lanes * 4
    vmem_bytes = 2 * (x_block_bytes + o_block_bytes) + (4 << 20)
    vmem_bytes = int(min(max(vmem_bytes, 32 << 20), 64 << 20))

    flops = 2 * n_pad * latent * (in_dim + 1)              # ~60 flops / point
    bytes_accessed = (n_pad * in_dim * jnp.dtype(io_dtype).itemsize
                      + n_pad * 4 + 4 * params.size)

    out = pl.pallas_call(
        partial(categorizer_kernel, in_dim=in_dim, latent=latent, strip=strip),
        out_shape=jax.ShapeDtypeStruct((n_rows, lanes), jnp.float32),
        grid_spec=pltpu.PrefetchScalarGridSpec(
            num_scalar_prefetch=0,
            grid=grid,
            in_specs=[
                pl.BlockSpec((in_dim, tile_rows, lanes), lambda i: (0, i, 0)),
                pl.BlockSpec(memory_space=pltpu.MemorySpace.SMEM),
            ],
            out_specs=pl.BlockSpec((tile_rows, lanes), lambda i: (i, 0)),
        ),
        compiler_params=pltpu.CompilerParams(
            dimension_semantics=("parallel",),
            vmem_limit_bytes=vmem_bytes),
        cost_estimate=pl.CostEstimate(
            flops=flops, transcendentals=0, bytes_accessed=bytes_accessed),
    )(xt, params)

    return out.reshape(-1)[:N].reshape(N, 1)


def init_params(key):
    # nn.Linear default init: U(-1/sqrt(fan_in), +1/sqrt(fan_in))
    latent_dim = 10
    k1, k2, k3, k4 = jax.random.split(key, 4)
    bound1 = 1.0 / jnp.sqrt(2.0)
    bound2 = 1.0 / jnp.sqrt(float(latent_dim))
    w1 = jax.random.uniform(k1, (2, latent_dim), jnp.float32, -bound1, bound1)
    b1 = jax.random.uniform(k2, (latent_dim,), jnp.float32, -bound1, bound1)
    w2 = jax.random.uniform(k3, (latent_dim, 1), jnp.float32, -bound2, bound2)
    b2 = jax.random.uniform(k4, (1,), jnp.float32, -bound2, bound2)
    return w1, b1, w2, b2


def reference_forward(x, w1, b1, w2, b2):
    h = jnp.maximum(x @ w1 + b1, 0.0)
    return h @ w2 + b2


if __name__ == "__main__":
    key = jax.random.PRNGKey(0)
    kx, kp = jax.random.split(key)
    w1, b1, w2, b2 = init_params(kp)

    # small batch of 2-D points, matching nn.Linear(2, ...)
    N = 256
    x = jax.random.normal(kx, (N, 2), jnp.float32)
    out = jax.block_until_ready(categorizer_forward(x, w1, b1, w2, b2))
    ref = reference_forward(x, w1, b1, w2, b2)
    assert out.shape == (N, 1)
    assert jnp.allclose(out, ref, atol=1e-5, rtol=1e-5), "mismatch vs reference (N=256)"

    # ragged batch exercises the pad-to-1024 + partial-tile path
    N2 = 77
    x2 = jax.random.normal(kx, (N2, 2), jnp.float32)
    out2 = jax.block_until_ready(categorizer_forward(x2, w1, b1, w2, b2))
    ref2 = reference_forward(x2, w1, b1, w2, b2)
    assert out2.shape == (N2, 1)
    assert jnp.allclose(out2, ref2, atol=1e-5, rtol=1e-5), "mismatch vs reference (N=77)"

    # bf16 HBM I/O path (compute stays f32): compare against the reference run
    # on the same bf16-rounded input so the check stays tight.
    out_bf = jax.block_until_ready(
        categorizer_forward(x, w1, b1, w2, b2, io_dtype=jnp.bfloat16))
    ref_bf = reference_forward(x.astype(jnp.bfloat16).astype(jnp.float32),
                               w1, b1, w2, b2)
    assert jnp.allclose(out_bf, ref_bf, atol=1e-4, rtol=1e-4), "mismatch (bf16 I/O)"

    print("KERNEL_OK")
</pallas_src>

<mosaic_0001>
module attributes {stable_mosaic.version = 11 : i64} {
  func.func @categorizer_kernel(%arg0: i32, %arg1: memref<2x8x128xf32, #tpu.memory_space<vmem>>, %arg2: memref<41xf32, #tpu.memory_space<smem>>, %arg3: memref<8x128xf32, #tpu.memory_space<vmem>>) attributes {dimension_semantics = [#tpu.dimension_semantics<parallel>], iteration_bounds = array<i64: 1>, scalar_prefetch = 0 : i64, scratch_operands = 0 : i64, tpu.core_type = #tpu.core_type<tc>, window_params = [{transform_indices = @transform_0, window_bounds = array<i64: 2, 8, 128>}, {transform_indices = @transform_1, window_bounds = array<i64: 41>}, {transform_indices = @transform_2, window_bounds = array<i64: 8, 128>}]} {
    %c0 = arith.constant 0 : index
    %0 = memref.load %arg2[%c0] : memref<41xf32, #tpu.memory_space<smem>>
    %c1 = arith.constant 1 : index
    %1 = memref.load %arg2[%c1] : memref<41xf32, #tpu.memory_space<smem>>
    %c2 = arith.constant 2 : index
    %2 = memref.load %arg2[%c2] : memref<41xf32, #tpu.memory_space<smem>>
    %c3 = arith.constant 3 : index
    %3 = memref.load %arg2[%c3] : memref<41xf32, #tpu.memory_space<smem>>
    %c4 = arith.constant 4 : index
    %4 = memref.load %arg2[%c4] : memref<41xf32, #tpu.memory_space<smem>>
    %c5 = arith.constant 5 : index
    %5 = memref.load %arg2[%c5] : memref<41xf32, #tpu.memory_space<smem>>
    %c6 = arith.constant 6 : index
    %6 = memref.load %arg2[%c6] : memref<41xf32, #tpu.memory_space<smem>>
    %c7 = arith.constant 7 : index
    %7 = memref.load %arg2[%c7] : memref<41xf32, #tpu.memory_space<smem>>
    %c8 = arith.constant 8 : index
    %8 = memref.load %arg2[%c8] : memref<41xf32, #tpu.memory_space<smem>>
    %c9 = arith.constant 9 : index
    %9 = memref.load %arg2[%c9] : memref<41xf32, #tpu.memory_space<smem>>
    %c10 = arith.constant 10 : index
    %10 = memref.load %arg2[%c10] : memref<41xf32, #tpu.memory_space<smem>>
    %c11 = arith.constant 11 : index
    %11 = memref.load %arg2[%c11] : memref<41xf32, #tpu.memory_space<smem>>
    %c12 = arith.constant 12 : index
    %12 = memref.load %arg2[%c12] : memref<41xf32, #tpu.memory_space<smem>>
    %c13 = arith.constant 13 : index
    %13 = memref.load %arg2[%c13] : memref<41xf32, #tpu.memory_space<smem>>
    %c14 = arith.constant 14 : index
    %14 = memref.load %arg2[%c14] : memref<41xf32, #tpu.memory_space<smem>>
    %c15 = arith.constant 15 : index
    %15 = memref.load %arg2[%c15] : memref<41xf32, #tpu.memory_space<smem>>
    %c16 = arith.constant 16 : index
    %16 = memref.load %arg2[%c16] : memref<41xf32, #tpu.memory_space<smem>>
    %c17 = arith.constant 17 : index
    %17 = memref.load %arg2[%c17] : memref<41xf32, #tpu.memory_space<smem>>
    %c18 = arith.constant 18 : index
    %18 = memref.load %arg2[%c18] : memref<41xf32, #tpu.memory_space<smem>>
    %c19 = arith.constant 19 : index
    %19 = memref.load %arg2[%c19] : memref<41xf32, #tpu.memory_space<smem>>
    %c20 = arith.constant 20 : index
    %20 = memref.load %arg2[%c20] : memref<41xf32, #tpu.memory_space<smem>>
    %c21 = arith.constant 21 : index
    %21 = memref.load %arg2[%c21] : memref<41xf32, #tpu.memory_space<smem>>
    %c22 = arith.constant 22 : index
    %22 = memref.load %arg2[%c22] : memref<41xf32, #tpu.memory_space<smem>>
    %c23 = arith.constant 23 : index
    %23 = memref.load %arg2[%c23] : memref<41xf32, #tpu.memory_space<smem>>
    %c24 = arith.constant 24 : index
    %24 = memref.load %arg2[%c24] : memref<41xf32, #tpu.memory_space<smem>>
    %c25 = arith.constant 25 : index
    %25 = memref.load %arg2[%c25] : memref<41xf32, #tpu.memory_space<smem>>
    %c26 = arith.constant 26 : index
    %26 = memref.load %arg2[%c26] : memref<41xf32, #tpu.memory_space<smem>>
    %c27 = arith.constant 27 : index
    %27 = memref.load %arg2[%c27] : memref<41xf32, #tpu.memory_space<smem>>
    %c28 = arith.constant 28 : index
    %28 = memref.load %arg2[%c28] : memref<41xf32, #tpu.memory_space<smem>>
    %c29 = arith.constant 29 : index
    %29 = memref.load %arg2[%c29] : memref<41xf32, #tpu.memory_space<smem>>
    %c30 = arith.constant 30 : index
    %30 = memref.load %arg2[%c30] : memref<41xf32, #tpu.memory_space<smem>>
    %c31 = arith.constant 31 : index
    %31 = memref.load %arg2[%c31] : memref<41xf32, #tpu.memory_space<smem>>
    %c32 = arith.constant 32 : index
    %32 = memref.load %arg2[%c32] : memref<41xf32, #tpu.memory_space<smem>>
    %c33 = arith.constant 33 : index
    %33 = memref.load %arg2[%c33] : memref<41xf32, #tpu.memory_space<smem>>
    %c34 = arith.constant 34 : index
    %34 = memref.load %arg2[%c34] : memref<41xf32, #tpu.memory_space<smem>>
    %c35 = arith.constant 35 : index
    %35 = memref.load %arg2[%c35] : memref<41xf32, #tpu.memory_space<smem>>
    %c36 = arith.constant 36 : index
    %36 = memref.load %arg2[%c36] : memref<41xf32, #tpu.memory_space<smem>>
    %c37 = arith.constant 37 : index
    %37 = memref.load %arg2[%c37] : memref<41xf32, #tpu.memory_space<smem>>
    %c38 = arith.constant 38 : index
    %38 = memref.load %arg2[%c38] : memref<41xf32, #tpu.memory_space<smem>>
    %c39 = arith.constant 39 : index
    %39 = memref.load %arg2[%c39] : memref<41xf32, #tpu.memory_space<smem>>
    %c40 = arith.constant 40 : index
    %40 = memref.load %arg2[%c40] : memref<41xf32, #tpu.memory_space<smem>>
    %c0_i32 = arith.constant 0 : i32
    %c8_i32 = arith.constant 8 : i32
    %41 = arith.muli %c0_i32, %c8_i32 : i32
    %42 = tpu.assume_multiple %41, 8 : i32
    %c0_0 = arith.constant 0 : index
    %43 = arith.index_cast %42 : i32 to index
    %c0_1 = arith.constant 0 : index
    %44 = vector.load %arg1[%c0_0, %43, %c0_1] : memref<2x8x128xf32, #tpu.memory_space<vmem>>, vector<1x8x128xf32>
    %45 = vector.shape_cast %44 : vector<1x8x128xf32> to vector<8x128xf32>
    %c1_2 = arith.constant 1 : index
    %46 = arith.index_cast %42 : i32 to index
    %c0_3 = arith.constant 0 : index
    %47 = vector.load %arg1[%c1_2, %46, %c0_3] : memref<2x8x128xf32, #tpu.memory_space<vmem>>, vector<1x8x128xf32>
    %48 = vector.shape_cast %47 : vector<1x8x128xf32> to vector<8x128xf32>
    %49 = vector.broadcast %40 : f32 to vector<8x128xf32>
    %50 = vector.broadcast %0 : f32 to vector<8x128xf32>
    %51 = arith.mulf %45, %50 : vector<8x128xf32>
    %52 = vector.broadcast %10 : f32 to vector<8x128xf32>
    %53 = arith.mulf %48, %52 : vector<8x128xf32>
    %54 = arith.addf %51, %53 : vector<8x128xf32>
    %55 = vector.broadcast %20 : f32 to vector<8x128xf32>
    %56 = arith.addf %54, %55 : vector<8x128xf32>
    %cst = arith.constant 0.000000e+00 : f32
    %57 = vector.broadcast %cst : f32 to vector<8x128xf32>
    %58 = arith.maximumf %56, %57 : vector<8x128xf32>
    %59 = vector.broadcast %30 : f32 to vector<8x128xf32>
    %60 = arith.mulf %58, %59 : vector<8x128xf32>
    %61 = arith.addf %49, %60 : vector<8x128xf32>
    %62 = vector.broadcast %1 : f32 to vector<8x128xf32>
    %63 = arith.mulf %45, %62 : vector<8x128xf32>
    %64 = vector.broadcast %11 : f32 to vector<8x128xf32>
    %65 = arith.mulf %48, %64 : vector<8x128xf32>
    %66 = arith.addf %63, %65 : vector<8x128xf32>
    %67 = vector.broadcast %21 : f32 to vector<8x128xf32>
    %68 = arith.addf %66, %67 : vector<8x128xf32>
    %cst_4 = arith.constant 0.000000e+00 : f32
    %69 = vector.broadcast %cst_4 : f32 to vector<8x128xf32>
    %70 = arith.maximumf %68, %69 : vector<8x128xf32>
    %71 = vector.broadcast %31 : f32 to vector<8x128xf32>
    %72 = arith.mulf %70, %71 : vector<8x128xf32>
    %73 = arith.addf %61, %72 : vector<8x128xf32>
    %74 = vector.broadcast %2 : f32 to vector<8x128xf32>
    %75 = arith.mulf %45, %74 : vector<8x128xf32>
    %76 = vector.broadcast %12 : f32 to vector<8x128xf32>
    %77 = arith.mulf %48, %76 : vector<8x128xf32>
    %78 = arith.addf %75, %77 : vector<8x128xf32>
    %79 = vector.broadcast %22 : f32 to vector<8x128xf32>
    %80 = arith.addf %78, %79 : vector<8x128xf32>
    %cst_5 = arith.constant 0.000000e+00 : f32
    %81 = vector.broadcast %cst_5 : f32 to vector<8x128xf32>
    %82 = arith.maximumf %80, %81 : vector<8x128xf32>
    %83 = vector.broadcast %32 : f32 to vector<8x128xf32>
    %84 = arith.mulf %82, %83 : vector<8x128xf32>
    %85 = arith.addf %73, %84 : vector<8x128xf32>
    %86 = vector.broadcast %3 : f32 to vector<8x128xf32>
    %87 = arith.mulf %45, %86 : vector<8x128xf32>
    %88 = vector.broadcast %13 : f32 to vector<8x128xf32>
    %89 = arith.mulf %48, %88 : vector<8x128xf32>
    %90 = arith.addf %87, %89 : vector<8x128xf32>
    %91 = vector.broadcast %23 : f32 to vector<8x128xf32>
    %92 = arith.addf %90, %91 : vector<8x128xf32>
    %cst_6 = arith.constant 0.000000e+00 : f32
    %93 = vector.broadcast %cst_6 : f32 to vector<8x128xf32>
    %94 = arith.maximumf %92, %93 : vector<8x128xf32>
    %95 = vector.broadcast %33 : f32 to vector<8x128xf32>
    %96 = arith.mulf %94, %95 : vector<8x128xf32>
    %97 = arith.addf %85, %96 : vector<8x128xf32>
    %98 = vector.broadcast %4 : f32 to vector<8x128xf32>
    %99 = arith.mulf %45, %98 : vector<8x128xf32>
    %100 = vector.broadcast %14 : f32 to vector<8x128xf32>
    %101 = arith.mulf %48, %100 : vector<8x128xf32>
    %102 = arith.addf %99, %101 : vector<8x128xf32>
    %103 = vector.broadcast %24 : f32 to vector<8x128xf32>
    %104 = arith.addf %102, %103 : vector<8x128xf32>
    %cst_7 = arith.constant 0.000000e+00 : f32
    %105 = vector.broadcast %cst_7 : f32 to vector<8x128xf32>
    %106 = arith.maximumf %104, %105 : vector<8x128xf32>
    %107 = vector.broadcast %34 : f32 to vector<8x128xf32>
    %108 = arith.mulf %106, %107 : vector<8x128xf32>
    %109 = arith.addf %97, %108 : vector<8x128xf32>
    %110 = vector.broadcast %5 : f32 to vector<8x128xf32>
    %111 = arith.mulf %45, %110 : vector<8x128xf32>
    %112 = vector.broadcast %15 : f32 to vector<8x128xf32>
    %113 = arith.mulf %48, %112 : vector<8x128xf32>
    %114 = arith.addf %111, %113 : vector<8x128xf32>
    %115 = vector.broadcast %25 : f32 to vector<8x128xf32>
    %116 = arith.addf %114, %115 : vector<8x128xf32>
    %cst_8 = arith.constant 0.000000e+00 : f32
    %117 = vector.broadcast %cst_8 : f32 to vector<8x128xf32>
    %118 = arith.maximumf %116, %117 : vector<8x128xf32>
    %119 = vector.broadcast %35 : f32 to vector<8x128xf32>
    %120 = arith.mulf %118, %119 : vector<8x128xf32>
    %121 = arith.addf %109, %120 : vector<8x128xf32>
    %122 = vector.broadcast %6 : f32 to vector<8x128xf32>
    %123 = arith.mulf %45, %122 : vector<8x128xf32>
    %124 = vector.broadcast %16 : f32 to vector<8x128xf32>
    %125 = arith.mulf %48, %124 : vector<8x128xf32>
    %126 = arith.addf %123, %125 : vector<8x128xf32>
    %127 = vector.broadcast %26 : f32 to vector<8x128xf32>
    %128 = arith.addf %126, %127 : vector<8x128xf32>
    %cst_9 = arith.constant 0.000000e+00 : f32
    %129 = vector.broadcast %cst_9 : f32 to vector<8x128xf32>
    %130 = arith.maximumf %128, %129 : vector<8x128xf32>
    %131 = vector.broadcast %36 : f32 to vector<8x128xf32>
    %132 = arith.mulf %130, %131 : vector<8x128xf32>
    %133 = arith.addf %121, %132 : vector<8x128xf32>
    %134 = vector.broadcast %7 : f32 to vector<8x128xf32>
    %135 = arith.mulf %45, %134 : vector<8x128xf32>
    %136 = vector.broadcast %17 : f32 to vector<8x128xf32>
    %137 = arith.mulf %48, %136 : vector<8x128xf32>
    %138 = arith.addf %135, %137 : vector<8x128xf32>
    %139 = vector.broadcast %27 : f32 to vector<8x128xf32>
    %140 = arith.addf %138, %139 : vector<8x128xf32>
    %cst_10 = arith.constant 0.000000e+00 : f32
    %141 = vector.broadcast %cst_10 : f32 to vector<8x128xf32>
    %142 = arith.maximumf %140, %141 : vector<8x128xf32>
    %143 = vector.broadcast %37 : f32 to vector<8x128xf32>
    %144 = arith.mulf %142, %143 : vector<8x128xf32>
    %145 = arith.addf %133, %144 : vector<8x128xf32>
    %146 = vector.broadcast %8 : f32 to vector<8x128xf32>
    %147 = arith.mulf %45, %146 : vector<8x128xf32>
    %148 = vector.broadcast %18 : f32 to vector<8x128xf32>
    %149 = arith.mulf %48, %148 : vector<8x128xf32>
    %150 = arith.addf %147, %149 : vector<8x128xf32>
    %151 = vector.broadcast %28 : f32 to vector<8x128xf32>
    %152 = arith.addf %150, %151 : vector<8x128xf32>
    %cst_11 = arith.constant 0.000000e+00 : f32
    %153 = vector.broadcast %cst_11 : f32 to vector<8x128xf32>
    %154 = arith.maximumf %152, %153 : vector<8x128xf32>
    %155 = vector.broadcast %38 : f32 to vector<8x128xf32>
    %156 = arith.mulf %154, %155 : vector<8x128xf32>
    %157 = arith.addf %145, %156 : vector<8x128xf32>
    %158 = vector.broadcast %9 : f32 to vector<8x128xf32>
    %159 = arith.mulf %45, %158 : vector<8x128xf32>
    %160 = vector.broadcast %19 : f32 to vector<8x128xf32>
    %161 = arith.mulf %48, %160 : vector<8x128xf32>
    %162 = arith.addf %159, %161 : vector<8x128xf32>
    %163 = vector.broadcast %29 : f32 to vector<8x128xf32>
    %164 = arith.addf %162, %163 : vector<8x128xf32>
    %cst_12 = arith.constant 0.000000e+00 : f32
    %165 = vector.broadcast %cst_12 : f32 to vector<8x128xf32>
    %166 = arith.maximumf %164, %165 : vector<8x128xf32>
    %167 = vector.broadcast %39 : f32 to vector<8x128xf32>
    %168 = arith.mulf %166, %167 : vector<8x128xf32>
    %169 = arith.addf %157, %168 : vector<8x128xf32>
    %170 = arith.index_cast %42 : i32 to index
    %c0_13 = arith.constant 0 : index
    %171 = vector.load %arg3[%170, %c0_13] : memref<8x128xf32, #tpu.memory_space<vmem>>, vector<8x128xf32>
    tpu.vector_store %arg3[%170, %c0_13], %169 {strides = array<i32>} : memref<8x128xf32, #tpu.memory_space<vmem>>, vector<8x128xf32>,
    %c1_i32 = arith.constant 1 : i32
    return
  }
  func.func @transform_0(%arg0: i32) -> (i32, i32, i32) {
    %c0_i32 = arith.constant 0 : i32
    %c0_i32_0 = arith.constant 0 : i32
    %c0_i32_1 = arith.constant 0 : i32
    return %c0_i32, %arg0, %c0_i32_0 : i32, i32, i32
  }
  func.func @transform_1(%arg0: i32) -> i32 {
    %c0_i32 = arith.constant 0 : i32
    %c0_i32_0 = arith.constant 0 : i32
    return %c0_i32 : i32
  }
  func.func @transform_2(%arg0: i32) -> (i32, i32) {
    %c0_i32 = arith.constant 0 : i32
    %c0_i32_0 = arith.constant 0 : i32
    return %arg0, %c0_i32 : i32, i32
  }
}

</mosaic_0001>

<bundles_post_ra>
// kernel: tpu_custom_call.1
= control target key start
LH: loop header
LB: loop body
LE: loop exit
PB: predicated region body
PF: predicated region fallthrough
CT: control target
= control target key end

     0   :  { %7 = vsyncpa [#allocation3], 0  ;;  %s499_s0 = inlined_call_operand.hbm [shape: f32[2,8,128], index: 0, kind: input, shape index: {}]   ;;  %s500_s1 = inlined_call_operand.vmem [shape: f32[41], index: 1, kind: input, shape index: {}]   ;;  %s501_s2 = inlined_call_operand.hbm [shape: f32[8,128], index: 2, kind: output, shape index: {}]  }
   0x1   :  { %8 = vsyncpa [#allocation5], 0 }
   0x2   :  { %9 = vsyncpa [#allocation4], 0  ;;  %s320_s9 = smov [#allocation2]   ;;  %s28_s13 = sshll.u32 %s500_s1, 4  ;;  %s29_s13 = int_to_ptr.vmem [resolvable:$true] %s28_s13 }
   0x3   :  { %s15_s10 = sshll.u32 %s320_s9, 4  ;;  %s258_s16 = scalar_lea.hbm %s499_s0, 256  ;;  %s16_s10 = int_to_ptr.vmem [resolvable:$true] %s15_s10 }
   0x4   :  { %p259_p0 = scmp.ne.s32.totalorder %s499_s0, %s258_s16  ;;  %p262_p1 = scmp.lt.u32.totalorder %s258_s16, %s499_s0 }
   0x6   :  { %p264_p2 = pnand %p262_p1, %p259_p0 }
   0x8   :  { %267 = shalt.err (!%p264_p2)
}
   0x9   :  { %s268_s21 = scalar_lea.vmem %s16_s10, 256  ;;  %p273_p4 = scmp.lt.s32.totalorder %s16_s10, %s16_s10 }
   0xa   :  { %p269_p3 = scmp.ne.s32.totalorder %s16_s10, %s268_s21  ;;  %p274_p5 = scmp.lt.s32.totalorder %s268_s21, %s268_s21 }
   0xc   :  { %p275_p6 = por %p274_p5, %p273_p4 }
   0xe   :  { %p276_p7 = pnand %p275_p6, %p269_p3 }
  0x10   :  { %279 = shalt.err (!%p276_p7)
}
  0x11   :  { %s321_s1 = smov 128   ;;  %s322_s22 = smov 8  }
  0x12   :  { %21 = dma.hbm_to_vmem [thread:$0]  %s499_s0, 256, %s16_s10, [#allocation3], %s321_s1, %s321_s1, %s322_s22  }
  0x13   :  { %s280_s25 = scalar_lea.vmem %s29_s13, 16  ;;  %p285_p9 = scmp.lt.s32.totalorder %s29_s13, %s29_s13 }
  0x14   :  { %p281_p8 = scmp.ne.s32.totalorder %s29_s13, %s280_s25  ;;  %p286_p10 = scmp.lt.s32.totalorder %s280_s25, %s280_s25 }
  0x16   :  { %p287_p11 = por %p286_p10, %p285_p9 }
  0x18   :  { %p288_p12 = pnand %p287_p11, %p281_p8 }
  0x1a   :  { %291 = shalt.err (!%p288_p12)
}
  0x1b   :  { %s323_s26 = smov [#allocation6]  }
  0x1c   :  { %31 = dma.vmem_to_smem %s29_s13, 16, %s323_s26, [#allocation5]  }
  0x1d   :  { %314 = dma.done.wait [#allocation3], 256  }
  0x1e   :  { %315 = vsyncadd [#allocation3], 4294967040 }
  0x1f   :  { %316 = dma.done.wait [#allocation5], 16  }
  0x20   :  { %317 = vsyncadd [#allocation5], 4294967280 }
  0x21   :  { %38 = sfence }
  0x22   :  { %s39_s27 = sld [smem:[#allocation6]]  ;;  %s213_s28 = sld [smem:[#allocation6 + $0x1]]  ;;  %v373_v0 = vld [vmem:[#allocation2] sm:$0xff]  ;;  %v384_v6 = vld [vmem:[#allocation2 + $0x8] sm:$0xff] }
  0x23   :  { %s214_s29 = sld [smem:[#allocation6 + $0x2]]  ;;  %s215_s30 = sld [smem:[#allocation6 + $0x3]] }
  0x24   :  { %s355_s0 = sld [smem:[#allocation6 + $0x4]]  ;;  %s357_s3 = sld [smem:[#allocation6 + $0x5]] }
  0x25   :  { %s359_s4 = sld [smem:[#allocation6 + $0x6]]  ;;  %s361_s5 = sld [smem:[#allocation6 + $0xa]] }
  0x26   :  { %s363_s6 = sld [smem:[#allocation6 + $0xb]]  ;;  %s365_s7 = sld [smem:[#allocation6 + $0xc]] }
  0x27   :  { %s367_s8 = sld [smem:[#allocation6 + $0xd]]  ;;  %s369_s9 = sld [smem:[#allocation6 + $0xe]] }
  0x28   :  { %s371_s10 = sld [smem:[#allocation6 + $0xf]]  ;;  %v85_v1 = vstv %s39_s27  ;;  %v96_v2 = vstv %s213_s28  ;;  %s377_s12 = sld [smem:[#allocation6 + $0x10]] }
  0x29   :  { %v107_v3 = vstv %s214_s29  ;;  %v118_v4 = vstv %s215_s30  ;;  %s375_s11 = sld [smem:[#allocation6 + $0x7]]  ;;  %s380_s13 = sld [smem:[#allocation6 + $0x8]]  ;;  %v86_v7 = vmul.f32 %v85_v1, %v373_v0  ;;  %v97_v8 = vmul.f32 %v96_v2, %v373_v0 }
  0x2a   :  { %v129_v5 = vstv %s355_s0  ;;  %s382_s14 = sld [smem:[#allocation6 + $0x9]]  ;;  %s386_s15 = sld [smem:[#allocation6 + $0x14]]  ;;  %v108_v9 = vmul.f32 %v107_v3, %v373_v0  ;;  %v119_v10 = vmul.f32 %v118_v4, %v373_v0  ;;  %v140_v14 = vstv %s357_s3 }
  0x2b   :  { %s388_s16 = sld [smem:[#allocation6 + $0x15]]  ;;  %s394_s17 = sld [smem:[#allocation6 + $0x16]]  ;;  %v87_v11 = vstv %s361_s5  ;;  %v130_v13 = vmul.f32 %v129_v5, %v373_v0  ;;  %v141_v26 = vmul.f32 %v140_v14, %v373_v0  ;;  %v151_v30 = vstv %s359_s4 }
  0x2c   :  { %s396_s18 = sld [smem:[#allocation6 + $0x17]]  ;;  %v98_v12 = vstv %s363_s6  ;;  %s402_s19 = sld [smem:[#allocation6 + $0x18]]  ;;  %v88_v15 = vmul.f32 %v87_v11, %v384_v6  ;;  %v109_v17 = vstv %s365_s7  ;;  %v152_v41 = vmul.f32 %v151_v30, %v373_v0 }
  0x2d   :  { %s404_s20 = sld [smem:[#allocation6 + $0x19]]  ;;  %v99_v16 = vmul.f32 %v98_v12, %v384_v6  ;;  %v120_v18 = vstv %s367_s8  ;;  %v110_v19 = vmul.f32 %v109_v17, %v384_v6  ;;  %v131_v21 = vstv %s369_s9  ;;  %s418_s1 = sld [smem:[#allocation6 + $0x1e]] }
  0x2e   :  { %v121_v20 = vmul.f32 %v120_v18, %v384_v6  ;;  %v142_v22 = vstv %s371_s10  ;;  %s414_s21 = sld [smem:[#allocation6 + $0x11]]  ;;  %v89_v23 = vadd.f32 %v88_v15, %v86_v7  ;;  %v132_v25 = vmul.f32 %v131_v21, %v384_v6  ;;  %s420_s22 = sld [smem:[#allocation6 + $0x1f]] }
  0x2f   :  { %v100_v24 = vadd.f32 %v99_v16, %v97_v8  ;;  %v111_v27 = vadd.f32 %v110_v19, %v108_v9  ;;  %v143_v29 = vmul.f32 %v142_v22, %v384_v6  ;;  %s424_s23 = sld [smem:[#allocation6 + $0x1a]]  ;;  %s426_s24 = sld [smem:[#allocation6 + $0x20]]  ;;  %v153_v34 = vstv %s377_s12 }
  0x30   :  { %v122_v28 = vadd.f32 %v121_v20, %v119_v10  ;;  %v90_v31 = vstv %s386_s15  ;;  %v133_v33 = vadd.f32 %v132_v25, %v130_v13  ;;  %s431_s25 = sld [smem:[#allocation6 + $0x12]]  ;;  %s433_s26 = sld [smem:[#allocation6 + $0x21]]  ;;  %v162_v42 = vstv %s375_s11 }
  0x31   :  { %v101_v32 = vstv %s388_s16  ;;  %v91_v35 = vadd.f32 %v90_v31, %v89_v23  ;;  %v112_v37 = vstv %s394_s17  ;;  %s437_s27 = sld [smem:[#allocation6 + $0x1b]]  ;;  %s444_s29 = sld [smem:[#allocation6 + $0x1c]]  ;;  %v144_v44 = vadd.f32 %v143_v29, %v141_v26 }
  0x32   :  { %v102_v36 = vadd.f32 %v101_v32, %v100_v24  ;;  %v123_v38 = vstv %s396_s18  ;;  %v113_v39 = vadd.f32 %v112_v37, %v111_v27  ;;  %v134_v40 = vstv %s402_s19  ;;  %s442_s28 = sld [smem:[#allocation6 + $0x13]]  ;;  %s448_s30 = sld [smem:[#allocation6 + $0x22]] }
  0x33   :  { %v92_v43 = vmax.f32 %v91_v35, 0.0  ;;  %v173_v45 = vstv %s380_s13  ;;  %v184_v46 = vstv %s382_s14  ;;  %s450_s0 = sld [smem:[#allocation6 + $0x28]]  ;;  %v124_v47 = vadd.f32 %v123_v38, %v122_v28  ;;  %s456_s3 = sld [smem:[#allocation6 + $0x1d]] }
  0x34   :  { %v135_v48 = vadd.f32 %v134_v40, %v133_v33  ;;  %v145_v49 = vstv %s404_s20  ;;  %v154_v50 = vmul.f32 %v153_v34, %v384_v6  ;;  %v93_v51 = vstv %s418_s1  ;;  %s458_s4 = sld [smem:[#allocation6 + $0x23]]  ;;  %s465_s5 = sld [smem:[#allocation6 + $0x24]] }
  0x35   :  { %v103_v52 = vmax.f32 %v102_v36, 0.0  ;;  %v163_v53 = vmul.f32 %v162_v42, %v373_v0  ;;  %v104_v54 = vstv %s420_s22  ;;  %v114_v55 = vmax.f32 %v113_v39, 0.0  ;;  %s471_s6 = sld [smem:[#allocation6 + $0x25]]  ;;  %s477_s7 = sld [smem:[#allocation6 + $0x26]] }
  0x36   :  { %v164_v56 = vstv %s414_s21  ;;  %v174_v57 = vmul.f32 %v173_v45, %v373_v0  ;;  %v94_v58 = vmul.f32 %v93_v51, %v92_v43  ;;  %v115_v59 = vstv %s426_s24  ;;  %s251_s8 = sld [smem:[#allocation6 + $0x27]]  ;;  %s324_s9 = smov [#allocation7]  }
  0x37   :  { %v146_v60 = vadd.f32 %v145_v49, %v144_v44  ;;  %v185_v61 = vmul.f32 %v184_v46, %v373_v0  ;;  %v125_v62 = vmax.f32 %v124_v47, 0.0  ;;  %v136_v63 = vmax.f32 %v135_v48, 0.0  ;;  %s202_s10 = sshll.u32 %s324_s9, 4  ;;  %s203_s10 = int_to_ptr.vmem [resolvable:$true] %s202_s10 }
  0x38   :  { %v155_v1 = vadd.f32 %v154_v50, %v152_v41  ;;  %v156_v2 = vstv %s424_s23  ;;  %v105_v3 = vmul.f32 %v104_v54, %v103_v52  ;;  %v126_v4 = vstv %s433_s26  ;;  %s292_s11 = scalar_lea.vmem %s203_s10, 128  ;;  %p297_p0 = scmp.lt.s32.totalorder %s203_s10, %s203_s10 }
  0x39   :  { %v165_v5 = vmul.f32 %v164_v56, %v384_v6  ;;  %v175_v7 = vstv %s431_s25  ;;  %v84_v8 = vstv %s450_s0  ;;  %v116_v9 = vmul.f32 %v115_v59, %v114_v55  ;;  %p293_p13 = scmp.ne.s32.totalorder %s203_s10, %s292_s11  ;;  %p298_p1 = scmp.lt.s32.totalorder %s292_s11, %s292_s11 }
  0x3a   :  { %v167_v10 = vstv %s437_s27  ;;  %v176_v0 = vmul.f32 %v175_v7, %v384_v6  ;;  %v95_v11 = vadd.f32 %v94_v58, %v84_v8  ;;  %v157_v12 = vadd.f32 %v156_v2, %v155_v1 }
  0x3b   :  { %v166_v13 = vadd.f32 %v165_v5, %v163_v53  ;;  %v186_v14 = vstv %s442_s28  ;;  %v137_v15 = vstv %s448_s30  ;;  %v178_v17 = vstv %s444_s29  ;;  %p299_p2 = por %p298_p1, %p297_p0 }
  0x3c   :  { %v177_v16 = vadd.f32 %v176_v0, %v174_v57  ;;  %v187_v18 = vmul.f32 %v186_v14, %v384_v6  ;;  %v106_v19 = vadd.f32 %v105_v3, %v95_v11  ;;  %v127_v20 = vmul.f32 %v126_v4, %v125_v62 }
  0x3d   :  { %v147_v21 = vmax.f32 %v146_v60, 0.0  ;;  %v168_v22 = vadd.f32 %v167_v10, %v166_v13  ;;  %v148_v23 = vstv %s458_s4  ;;  %v189_v25 = vstv %s456_s3  ;;  %p300_p3 = pnand %p299_p2, %p293_p13 }
  0x3e   :  { %v188_v24 = vadd.f32 %v187_v18, %v185_v61  ;;  %v117_v26 = vadd.f32 %v116_v9, %v106_v19  ;;  %v138_v27 = vmul.f32 %v137_v15, %v136_v63  ;;  %v158_v28 = vmax.f32 %v157_v12, 0.0 }
  0x3f   :  { %v179_v29 = vadd.f32 %v178_v17, %v177_v16  ;;  %v159_v30 = vstv %s465_s5  ;;  %v149_v32 = vmul.f32 %v148_v23, %v147_v21  ;;  %v169_v33 = vmax.f32 %v168_v22, 0.0 }
  0x40   :  { %v128_v31 = vadd.f32 %v127_v20, %v117_v26  ;;  %v190_v34 = vadd.f32 %v189_v25, %v188_v24  ;;  %v170_v6 = vstv %s471_s6  ;;  %v160_v36 = vmul.f32 %v159_v30, %v158_v28 }
  0x41   :  { %v180_v37 = vmax.f32 %v179_v29, 0.0  ;;  %v181_v38 = vstv %s477_s7  ;;  %v171_v40 = vmul.f32 %v170_v6, %v169_v33  ;;  %v192_v42 = vstv %s251_s8 }
  0x42   :  { %v139_v35 = vadd.f32 %v138_v27, %v128_v31  ;;  %v191_v41 = vmax.f32 %v190_v34, 0.0 }
  0x43   :  { %v182_v44 = vmul.f32 %v181_v38, %v180_v37 }
  0x44   :  { %v150_v39 = vadd.f32 %v149_v32, %v139_v35  ;;  %v193_v46 = vmul.f32 %v192_v42, %v191_v41 }
  0x46   :  { %v161_v43 = vadd.f32 %v160_v36, %v150_v39 }
  0x48   :  { %v172_v45 = vadd.f32 %v171_v40, %v161_v43 }
  0x4a   :  { %v183_v47 = vadd.f32 %v182_v44, %v172_v45 }
  0x4c   :  { %v194_v48 = vadd.f32 %v193_v46, %v183_v47 }
  0x4e   :  { %195 = vst [vmem:[#allocation7] sm:$0xff] %v194_v48 }
  0x4f   :  { %303 = shalt.err (!%p300_p3)
}
  0x50   :  { %s304_s14 = scalar_lea.hbm %s501_s2, 128 }
  0x51   :  { %p305_p4 = scmp.ne.s32.totalorder %s501_s2, %s304_s14  ;;  %p308_p5 = scmp.lt.u32.totalorder %s304_s14, %s501_s2 }
  0x53   :  { %p310_p6 = pnand %p308_p5, %p305_p4 }
  0x55   :  { %313 = shalt.err (!%p310_p6)
}
  0x56   :  { %205 = dma.vmem_to_hbm [thread:$0]  %s203_s10, 128, %s501_s2, [#allocation4]  }
  0x57   :  { %318 = dma.done.wait [#allocation4], 128  }
  0x58   :  { %319 = vsyncadd [#allocation4], 4294967168 }
  0x59   :  { %209 = vsyncpa [#allocation3], 1 }
  0x5a   :  { %210 = vsyncpa [#allocation4], 1 }
  0x5b   :  { %211 = vsyncpa [#allocation5], 1 }

</bundles_post_ra>
